<compile_context>
chip_gen: v6e
topology: v6e:2x2x1
jax: 0.10.0
libtpu: 0.0.40
codegen_flags: <defaults>
</compile_context>

<pallas_src>
import functools

import numpy as np
import jax
import jax.numpy as jnp
from jax import lax
from jax.experimental import pallas as pl
from jax.experimental.pallas import tpu as pltpu


def _round_up(x, m):
    return ((x + m - 1) // m) * m


def _vocab_usage_kernel(ign_ref, slot_ref, x_ref, out_ref, keep_acc, *, slot_rows):
    """Grid = (input_select, batch_tile). Accumulate keep mask; finalize -> count."""
    i = pl.program_id(1)
    n_i = pl.num_programs(1)

    @pl.when(i == 0)
    def _init():
        keep_acc[...] = jnp.zeros_like(keep_acc)

    tb, l = x_ref.shape
    # Hoist the sublane broadcast of the ignored-index row out of the loop.
    ign8 = jnp.broadcast_to(ign_ref[...], (8, l))
    acc = keep_acc[...]                                    # (8, L) int32
    # Fold the (tb, L) tile into 8 sublanes with pure elementwise VPU maxima;
    # no cross-sublane / cross-lane (XLU) reductions in the hot loop.
    for r in range(tb // 8):                               # static, tb <= 128
        hit = (x_ref[r * 8:(r + 1) * 8, :] == ign8).astype(jnp.int32)
        acc = jnp.maximum(acc, hit)
    keep_acc[...] = acc

    @pl.when(i == n_i - 1)
    def _finalize():
        # Single reductions, done once per input (not per grid step).
        keep = jnp.max(keep_acc[...], axis=0, keepdims=True) > 0      # (1, L)
        # Dropped lanes -> slot -1 (matches nothing); kept lanes -> dedup slot.
        slot = jnp.where(keep, slot_ref[...], -1)                     # (1, L)
        iota_s = lax.broadcasted_iota(jnp.int32, (slot_rows, l), 0)   # (S, L)
        present = jnp.max((slot == iota_s).astype(jnp.float32),
                          axis=1, keepdims=True)                      # (S, 1)
        cnt = jnp.sum(present)                                        # scalar f32
        # Lane-dense (8, 128) output slab -> unmasked vector stores.
        out_ref[...] = jnp.broadcast_to(cnt, out_ref.shape)


def global_tensor_vocab_usage(preds, captions, ignored_indexes):
    """Pallas implementation of GlobalTensorVocabUsage.forward (fresh state)."""
    preds = jnp.asarray(preds, dtype=jnp.int32)
    captions = jnp.asarray(captions, dtype=jnp.int32)
    if preds.ndim != 2 or captions.ndim != 2:
        raise ValueError("preds and captions must be (bsize, len) tensors")

    bp, lp = preds.shape
    bc, lc = captions.shape

    ign_list = [int(v) for v in ignored_indexes]
    n_ign = len(ign_list)
    if n_ign not in (1, lp) or n_ign not in (1, lc):
        raise ValueError(
            f"ignored_indexes of length {n_ign} does not broadcast against "
            f"pred_len={lp} / capt_len={lc}")

    # Host-side (static) dedup of the ignored set -> slot ids.  Handles
    # negative ids and ids >= 128 without any vocab-range assumption.
    uniq = sorted(set(ign_list))
    slot_of = {v: i for i, v in enumerate(uniq)}
    slots_list = [slot_of[v] for v in ign_list]
    slot_rows = _round_up(max(len(uniq), 8), 8)

    # Positional broadcast of the ignored indexes (torch `x == list` semantics).
    l_max = max(lp, lc)
    ign_full = np.broadcast_to(np.asarray(ign_list, np.int32), (l_max,))
    slot_full = np.broadcast_to(np.asarray(slots_list, np.int32), (l_max,))

    # Padding: lane dim to a multiple of 128, batch to a multiple of the tile.
    l_pad = _round_up(max(l_max, 128), 128)
    b8 = _round_up(max(bp, bc, 8), 8)
    # Batch tile: multiple of 8, <= 128 rows, <= ~1 MiB per input block
    # (double-buffered this stays well inside v7x's 64 MiB / 32 MiB-scoped VMEM).
    tb = min(b8, 128, max(8, ((1 << 20) // (4 * l_pad)) // 8 * 8))
    b_pad = _round_up(b8, tb)

    ign_pad = np.zeros((l_pad,), np.int32)
    ign_pad[:l_max] = ign_full
    slot_pad = np.zeros((l_pad,), np.int32)
    slot_pad[:l_max] = slot_full
    # Fill value that can never equal the ignored index at its own lane.
    fill_row = jnp.asarray(ign_pad + 1, jnp.int32)

    def _pad(x):
        b, l = x.shape
        base = jnp.broadcast_to(fill_row[None, :], (b_pad, l_pad))
        return base.at[:b, :l].set(x)

    x_all = jnp.stack([_pad(preds), _pad(captions)], axis=0)       # (2, B, L)
    ign_arr = jnp.asarray(ign_pad).reshape(1, l_pad)
    slot_arr = jnp.asarray(slot_pad).reshape(1, l_pad)

    grid = (2, b_pad // tb)
    out = pl.pallas_call(
        functools.partial(_vocab_usage_kernel, slot_rows=slot_rows),
        out_shape=jax.ShapeDtypeStruct((2, 8, 128), jnp.float32),
        grid=grid,
        in_specs=[
            pl.BlockSpec((1, l_pad), lambda s, i: (0, 0)),
            pl.BlockSpec((1, l_pad), lambda s, i: (0, 0)),
            pl.BlockSpec((None, tb, l_pad), lambda s, i: (s, i, 0)),
        ],
        out_specs=pl.BlockSpec((None, 8, 128), lambda s, i: (s, 0, 0)),
        scratch_shapes=[pltpu.VMEM((8, l_pad), jnp.int32)],
        compiler_params=pltpu.CompilerParams(
            dimension_semantics=("parallel", "arbitrary"),
            vmem_limit_bytes=32 * 1024 * 1024,
        ),
    )(ign_arr, slot_arr, x_all)

    counts = out[:, 0, 0]                  # (2,): |hyp_vocab|, |ref_vocab|
    cp, cc = counts[0], counts[1]
    return jnp.where(cc > 0, cp / jnp.maximum(cc, 1.0), jnp.float32(0.0))


def _reference(preds, captions, ignored_indexes):
    """NumPy replica of the exact torch forward semantics."""
    ign = np.asarray(list(ignored_indexes))
    p = np.asarray(preds)
    c = np.asarray(captions)
    kept_p = p[np.equal(p, ign)]
    kept_c = c[np.equal(c, ign)]
    pv = np.unique(kept_p)
    cv = np.unique(kept_c)
    return float(len(pv)) / float(len(cv)) if len(cv) > 0 else 0.0


if __name__ == "__main__":
    key = jax.random.PRNGKey(0)
    k1, k2, k3, k4 = jax.random.split(key, 4)

    # Case 1: one ignored index per sequence position (positional broadcast).
    B, L = 2, 8
    ignored = [0, 1, 2, 3, 4, 5, 6, 7]
    preds = jax.random.randint(k1, (B, L), 0, 12, dtype=jnp.int32)
    capts = jax.random.randint(k2, (B, L), 0, 12, dtype=jnp.int32)
    got = float(jax.block_until_ready(global_tensor_vocab_usage(preds, capts, ignored)))
    want = _reference(preds, capts, ignored)
    assert abs(got - want) < 1e-6, f"case1 mismatch: kernel={got} ref={want}"

    # Case 2: scalar ignored index, different batch/length for preds vs captions.
    ignored2 = [5]
    preds2 = jax.random.randint(k3, (3, 10), 0, 9, dtype=jnp.int32)
    capts2 = jax.random.randint(k4, (2, 6), 0, 9, dtype=jnp.int32)
    got2 = float(jax.block_until_ready(global_tensor_vocab_usage(preds2, capts2, ignored2)))
    want2 = _reference(preds2, capts2, ignored2)
    assert abs(got2 - want2) < 1e-6, f"case2 mismatch: kernel={got2} ref={want2}"

    # Case 3: ignored indexes outside [0, 128), negative, with duplicates.
    ignored3 = [-100, 3, 3, 200, 7, 7, 0, 500]
    got3 = float(jax.block_until_ready(global_tensor_vocab_usage(preds, capts, ignored3)))
    want3 = _reference(preds, capts, ignored3)
    assert abs(got3 - want3) < 1e-6, f"case3 mismatch: kernel={got3} ref={want3}"

    print("KERNEL_OK")
</pallas_src>

<mosaic_0001>
module attributes {stable_mosaic.version = 11 : i64} {
  func.func @_vocab_usage_kernel(%arg0: i32, %arg1: i32, %arg2: memref<1x128xi32, #tpu.memory_space<vmem>>, %arg3: memref<1x128xi32, #tpu.memory_space<vmem>>, %arg4: memref<1x8x128xi32, #tpu.memory_space<vmem>>, %arg5: memref<1x8x128xf32, #tpu.memory_space<vmem>>, %arg6: memref<8x128xi32, #tpu.memory_space<vmem>>) attributes {dimension_semantics = [#tpu.dimension_semantics<parallel>, #tpu.dimension_semantics<arbitrary>], iteration_bounds = array<i64: 2, 1>, scalar_prefetch = 0 : i64, scratch_operands = 1 : i64, tpu.core_type = #tpu.core_type<tc>, window_params = [{pipeline_mode = #tpu.pipeline_mode<synchronous>, transform_indices = @transform_0, window_bounds = array<i64: 1, 128>}, {pipeline_mode = #tpu.pipeline_mode<synchronous>, transform_indices = @transform_1, window_bounds = array<i64: 1, 128>}, {transform_indices = @transform_2, window_bounds = array<i64: 1, 8, 128>}, {transform_indices = @transform_3, window_bounds = array<i64: 1, 8, 128>}]} {
    %c0_i32 = arith.constant 0 : i32
    %0 = arith.cmpi eq, %arg1, %c0_i32 : i32
    %1 = arith.extui %0 : i1 to i32
    %c0_i32_0 = arith.constant 0 : i32
    %2 = arith.cmpi ne, %1, %c0_i32_0 : i32
    scf.if %2 {
      %c0_i32_11 = arith.constant 0 : i32
      %16 = vector.broadcast %c0_i32_11 : i32 to vector<8x128xi32>
      %c0_12 = arith.constant 0 : index
      %c0_13 = arith.constant 0 : index
      %17 = vector.load %arg6[%c0_12, %c0_13] : memref<8x128xi32, #tpu.memory_space<vmem>>, vector<8x128xi32>
      tpu.vector_store %arg6[%c0_12, %c0_13], %16 {strides = array<i32>} : memref<8x128xi32, #tpu.memory_space<vmem>>, vector<8x128xi32>,
    } else {
    }
    %c0 = arith.constant 0 : index
    %c0_1 = arith.constant 0 : index
    %3 = vector.load %arg2[%c0, %c0_1] : memref<1x128xi32, #tpu.memory_space<vmem>>, vector<1x128xi32>
    %4 = vector.shape_cast %3 : vector<1x128xi32> to vector<1x128xi32>
    %5 = vector.broadcast %4 : vector<1x128xi32> to vector<8x128xi32>
    %c0_2 = arith.constant 0 : index
    %c0_3 = arith.constant 0 : index
    %6 = vector.load %arg6[%c0_2, %c0_3] : memref<8x128xi32, #tpu.memory_space<vmem>>, vector<8x128xi32>
    %c0_4 = arith.constant 0 : index
    %c0_5 = arith.constant 0 : index
    %c0_6 = arith.constant 0 : index
    %7 = vector.load %arg4[%c0_4, %c0_5, %c0_6] : memref<1x8x128xi32, #tpu.memory_space<vmem>>, vector<1x8x128xi32>
    %8 = vector.shape_cast %7 : vector<1x8x128xi32> to vector<8x128xi32>
    %9 = arith.cmpi eq, %8, %5 : vector<8x128xi32>
    %10 = arith.extui %9 : vector<8x128xi1> to vector<8x128xi32>
    %11 = arith.maxsi %6, %10 : vector<8x128xi32>
    %c0_7 = arith.constant 0 : index
    %c0_8 = arith.constant 0 : index
    %12 = vector.load %arg6[%c0_7, %c0_8] : memref<8x128xi32, #tpu.memory_space<vmem>>, vector<8x128xi32>
    tpu.vector_store %arg6[%c0_7, %c0_8], %11 {strides = array<i32>} : memref<8x128xi32, #tpu.memory_space<vmem>>, vector<8x128xi32>,
    %c0_i32_9 = arith.constant 0 : i32
    %13 = arith.cmpi eq, %arg1, %c0_i32_9 : i32
    %14 = arith.extui %13 : i1 to i32
    %c0_i32_10 = arith.constant 0 : i32
    %15 = arith.cmpi ne, %14, %c0_i32_10 : i32
    scf.if %15 {
      %c0_11 = arith.constant 0 : index
      %c0_12 = arith.constant 0 : index
      %16 = vector.load %arg6[%c0_11, %c0_12] : memref<8x128xi32, #tpu.memory_space<vmem>>, vector<8x128xi32>
      %cst = arith.constant dense<-2147483648> : vector<128xi32>
      %17 = vector.multi_reduction <maxsi>, %16, %cst [0] : vector<8x128xi32> to vector<128xi32>
      %18 = vector.shape_cast %17 : vector<128xi32> to vector<1x128xi32>
      %c0_i32_13 = arith.constant 0 : i32
      %19 = vector.broadcast %c0_i32_13 : i32 to vector<1x128xi32>
      %20 = arith.cmpi sgt, %18, %19 : vector<1x128xi32>
      %c0_14 = arith.constant 0 : index
      %c0_15 = arith.constant 0 : index
      %21 = vector.load %arg3[%c0_14, %c0_15] : memref<1x128xi32, #tpu.memory_space<vmem>>, vector<1x128xi32>
      %c-1_i32 = arith.constant -1 : i32
      %22 = vector.broadcast %c-1_i32 : i32 to vector<1x128xi32>
      %23 = arith.select %20, %21, %22 : vector<1x128xi1>, vector<1x128xi32>
      %24 = tpu.iota {dimensions = array<i32: 0>} : vector<8x128xi32>
      %25 = vector.broadcast %23 : vector<1x128xi32> to vector<8x128xi32>
      %26 = arith.cmpi eq, %25, %24 : vector<8x128xi32>
      %27 = arith.extui %26 : vector<8x128xi1> to vector<8x128xi32>
      %28 = arith.sitofp %27 : vector<8x128xi32> to vector<8x128xf32>
      %cst_16 = arith.constant dense<0xFF800000> : vector<8xf32>
      %29 = vector.multi_reduction <maximumf>, %28, %cst_16 [1] : vector<8x128xf32> to vector<8xf32>
      %30 = vector.shape_cast %29 : vector<8xf32> to vector<8x1xf32>
      %31 = vector.shape_cast %30 : vector<8x1xf32> to vector<1x8x1xf32>
      %cst_17 = arith.constant dense<0.000000e+00> : vector<1xf32>
      %32 = vector.multi_reduction <add>, %31, %cst_17 [1, 2] : vector<1x8x1xf32> to vector<1xf32>
      %33 = vector.shape_cast %32 : vector<1xf32> to vector<1x1x1xf32>
      %34 = vector.extract %33[0, 0, 0] : f32 from vector<1x1x1xf32>
      %35 = vector.broadcast %34 : f32 to vector<8x128xf32>
      %c0_18 = arith.constant 0 : index
      %c0_19 = arith.constant 0 : index
      %c0_20 = arith.constant 0 : index
      %36 = vector.load %arg5[%c0_18, %c0_19, %c0_20] : memref<1x8x128xf32, #tpu.memory_space<vmem>>, vector<1x8x128xf32>
      %37 = vector.shape_cast %36 : vector<1x8x128xf32> to vector<8x128xf32>
      %38 = vector.shape_cast %35 : vector<8x128xf32> to vector<1x8x128xf32>
      tpu.vector_store %arg5[%c0_18, %c0_19, %c0_20], %38 {strides = array<i32>} : memref<1x8x128xf32, #tpu.memory_space<vmem>>, vector<1x8x128xf32>,
    } else {
    }
    return
  }
  func.func @transform_0(%arg0: i32, %arg1: i32) -> (i32, i32) {
    %c0_i32 = arith.constant 0 : i32
    %c0_i32_0 = arith.constant 0 : i32
    %c0_i32_1 = arith.constant 0 : i32
    return %c0_i32, %c0_i32_0 : i32, i32
  }
  func.func @transform_1(%arg0: i32, %arg1: i32) -> (i32, i32) {
    %c0_i32 = arith.constant 0 : i32
    %c0_i32_0 = arith.constant 0 : i32
    %c0_i32_1 = arith.constant 0 : i32
    return %c0_i32, %c0_i32_0 : i32, i32
  }
  func.func @transform_2(%arg0: i32, %arg1: i32) -> (i32, i32, i32) {
    %c0_i32 = arith.constant 0 : i32
    %c0_i32_0 = arith.constant 0 : i32
    return %arg0, %arg1, %c0_i32 : i32, i32, i32
  }
  func.func @transform_3(%arg0: i32, %arg1: i32) -> (i32, i32, i32) {
    %c0_i32 = arith.constant 0 : i32
    %c0_i32_0 = arith.constant 0 : i32
    %c0_i32_1 = arith.constant 0 : i32
    return %arg0, %c0_i32, %c0_i32_0 : i32, i32, i32
  }
}

</mosaic_0001>

<bundles_post_ra>
// kernel: tpu_custom_call.1
= control target key start
LH: loop header
LB: loop body
LE: loop exit
PB: predicated region body
PF: predicated region fallthrough
CT: control target
= control target key end

     0   :  { %8 = vsyncpa [#allocation4], 0  ;;  %s810_s0 = inlined_call_operand.hbm [shape: s32[1,128], index: 0, kind: input, shape index: {}]   ;;  %s811_s1 = inlined_call_operand.vmem [shape: s32[1,128], index: 1, kind: input, shape index: {}]   ;;  %s812_s2 = inlined_call_operand.hbm [shape: s32[2,8,128], index: 2, kind: input, shape index: {}]   ;;  %s813_s3 = inlined_call_operand.hbm [shape: f32[2,8,128], index: 3, kind: output, shape index: {}]  }
   0x1   :  { %9 = vsyncpa [#allocation7], 0 }
   0x2   :  { %11 = vsyncpa [#allocation7 + $0x1], 0 }
   0x3   :  { %12 = vsyncpa [#allocation5], 0 }
   0x4   :  { %14 = vsyncpa [#allocation5 + $0x1], 0  ;;  %s636_s12 = smov 0   ;;  %s638_s13 = smov 0  }
   0x5   :  { %s640_s14 = smov 0   ;;  %s642_s15 = smov 0  }
   0x6   :  { %s644_s16 = smov 0   ;;  %s646_s17 = smov 0  }
   0x7 LB: > { %s376_s18 = sadd.s32 4294967295, %s609_s17   ;;  %s377_s19 = sadd.s32 4294967294, %s609_s17   ;;  %s609_s17 = sphi %s646_s17, %s20_s17   ;;  %s605_s16 = sphi %s644_s16, %s830_s16   ;;  %s601_s15 = sphi %s642_s15, %s829_s15   ;;  %s597_s14 = sphi %s640_s14, %s828_s14   ;;  %s593_s13 = sphi %s638_s13, %s827_s13   ;;  %s589_s12 = sphi %s636_s12, %s826_s12  }
   0x8   : > { %p96_p0 = scmp.ne.s32.totalorder %s593_s13, %s589_s12  ;;  %p670_p1 = scmp.eq.s32.totalorder %s376_s18, 0 }
   0x9   : > { %p674_p2 = scmp.eq.s32.totalorder %s376_s18, 1  ;;  %p126_p3 = scmp.eq.s32.totalorder %s377_s19, 1 }
   0xa   : > { %p680_p4 = por %p670_p1, %p96_p0  ;;  %p378_p5 = scmp.ge.s32.totalorder %s609_s17, 1 }
   0xb   : > { %p685_p6 = por %p126_p3, %p96_p0  ;;  %p133_p7 = scmp.lt.s32.totalorder %s609_s17, 3 }
   0xc   : > { %s817_s22 = scalar_select %p680_p4, 1, 0 }
   0xd   : > { %s818_s23 = scalar_select %p685_p6, 1, 0 }
   0xe   : > { %p690_p8 = pnand %p378_p5, %p133_p7  ;;  %s611_s25 = smov [#allocation3]  }
   0xf   : > { %s146_s26 = sshll.u32 %s611_s25, 4  ;;  %s32_s28 = sadd.s32 1, %s605_s16  ;;  %s147_s26 = int_to_ptr.vmem [resolvable:$true] %s146_s26 }
  0x10   : > { %p404_p10 = pneg %p690_p8  ;;  %s83_s29 = sadd.s32 1, %s597_s14 }
  0x11   : > { %p34_p12 = scmp.ge.s32.totalorder %s32_s28, 2  ;;  %s482_s30 = scalar_lea.vmem %s147_s26, 16 }
  0x12   : > { %p699_p11 = pnand %p404_p10, %p670_p1  ;;  %p483_p0 = scmp.ne.s32.totalorder %s147_s26, %s482_s30 }
  0x13   : > { %s489_s4 = scalar_lea.vmem %s147_s26, 32  ;;  %p490_p7 = scmp.lt.s32.totalorder %s147_s26, %s147_s26 }
  0x14   : > { %p473_p13 = pneg %p699_p11  ;;  %p491_p9 = scmp.lt.s32.totalorder %s489_s4, %s482_s30 }
  0x16   : > { %p485_p3 = pnand %p483_p0, %p473_p13  ;;  %p492_p6 = por %p491_p9, %p490_p7 }
  0x18   : > { %p486_p5 = pneg %p485_p3 }
  0x1a   : > { %p493_p4 = pnand %p492_p6, %p486_p5 }
  0x1c   : > { %496 = shalt.err (!%p493_p4)
}
  0x1d   : > { %407 = dma.hbm_to_vmem [thread:$0]  (!%p699_p11), %s810_s0, 16, %s147_s26, [#allocation4]  }
  0x1e   : > { %s832_s28 = smov (%p34_p12, %s32_s28), 0  ;;  %p90_p6 = scmp.ne.s32.totalorder %s597_s14, %s593_s13 }
  0x1f   : > { %p91_p4 = scmp.eq.s32.totalorder %s609_s17, 0  ;;  %s78_s7 = ssub.s32 %s605_s16, %s832_s28 }
  0x20   : > { %p417_p9 = scmp.lt.s32.totalorder %s609_s17, 2  ;;  %p81_p10 = scmp.eq.s32.totalorder %s78_s7, 0 }
  0x21   : > { %p92_p13 = por %p91_p4, %p90_p6  ;;  %p722_p0 = por %p674_p2, %p90_p6 }
  0x22   : > { %s160_s9 = sand.u32 1, %s597_s14   ;;  %s382_s18 = sshll.u32 %s605_s16, 7 }
  0x23   : > { %s728_s10 = scalar_select %p81_p10, %s597_s14, %s83_s29  }
  0x24   : > { %s381_s11 = sshll.u32 %s160_s9, 3  ;;  %s170_s26 = scalar_lea.hbm %s812_s2, %s382_s18 }
  0x25   : > { %s164_s27 = scalar_lea.vmem [#allocation6], %s381_s11  ;;  %p734_p11 = pnand %p417_p9, %p92_p13 }
  0x26   : > { %s172_s30 = sshll.u32 %s164_s27, 4  ;;  %s161_s21 = scalar_lea.sflag [#allocation7], %s160_s9  ;;  %s173_s30 = int_to_ptr.vmem [resolvable:$true] %s172_s30 }
  0x27   : > { %p499_p2 = pneg %p734_p11  ;;  %s510_s5 = scalar_lea.vmem %s173_s30, 128 }
  0x28   : > { %p511_p12 = scmp.ne.s32.totalorder %s173_s30, %s510_s5  ;;  %s612_s29 = smov [#allocation6]  }
  0x29   : > { %s515_s6 = sshll.u32 %s612_s29, 4  ;;  %s516_s6 = int_to_ptr.vmem [resolvable:$false] %s515_s6 }
  0x2a   : > { %p513_p3 = pnand %p511_p12, %p499_p2  ;;  %s517_s7 = scalar_lea.vmem %s516_s6, 256 }
  0x2b   : > { %p518_p7 = scmp.lt.s32.totalorder %s173_s30, %s516_s6  ;;  %p519_p6 = scmp.lt.s32.totalorder %s517_s7, %s510_s5 }
  0x2c   : > { %p514_p5 = pneg %p513_p3 }
  0x2d   : > { %p520_p4 = por %p519_p6, %p518_p7 }
  0x2f   : > { %p521_p10 = pnand %p520_p4, %p514_p5 }
  0x31   : > { %524 = shalt.err (!%p521_p10)
}
  0x32   : > { %411 = dma.hbm_to_vmem [thread:$0]  (!%p734_p11), %s170_s26, 128, %s173_s30, %s161_s21  }
  0x33   : > { %181 = sbr.rel (%p690_p8) target bundleno = 437 (0x1b5), region = 32 }
  0x38   : > { %576 = dma.done.wait (%p670_p1), [#allocation4], 16  }
  0x39   : > { %578 = vsyncadd (%p670_p1), [#allocation4], 4294967280  ;;  %s749_s9 = sand.u32 1, %s593_s13   ;;  %p823_p9 = scmp.ne.s32.totalorder %s817_s22, 0 }
  0x3a   : > { %s385_s11 = sshll.u32 %s749_s9, 3  ;;  %s188_s18 = scalar_lea.sflag [#allocation7], %s749_s9 }
  0x3b   : > { %s191_s19 = scalar_lea.vmem [#allocation6], %s385_s11 }
  0x3c   : > { %580 = dma.done.wait (%p823_p9), %s188_s18, 128  }
  0x3d   : > { %582 = vsyncadd (%p823_p9), %s188_s18, 4294967168  ;;  %v387_v0 = vld [vmem:[#allocation3] ss:$0 sm:$0xff]  ;;  %v225_v1 = vld [vmem:[%s191_s19] sm:$0xff]  ;;  %v613_v2 = vmov 0   ;;  %v247_v6 = vlaneseq  ;;  %v614_v17 = vmov 0.0  }
  0x3e   : > { %vm226_vm0 = vcmp.eq.s32.totalorder %v225_v1, %v387_v0  ;;  %v245_v12 = vld [vmem:[%s811_s1] sm:$0x1]  ;;  %vm258_vm7 = vcmask 7168   ;;  %s213_s24 = scalar_lea.vmem [#allocation8], %s385_s11  ;;  %s390_s26 = sshll.u32 %s601_s15, 7 }
  0x3f   : > { %v227_v3 = vsel %vm226_vm0, 1, %v613_v2  ;;  %v248_v9 = vshrl.u32 %v247_v6, 7  ;;  %s285_s25 = sshll.u32 %s213_s24, 4  ;;  %s283_s21 = scalar_lea.hbm %s813_s3, %s390_s26  ;;  %s765_s25 = int_to_ptr.vmem [resolvable:$true] %s285_s25 }
  0x40   : > { %vm393_vm1 = vcmp.lt.s32.totalorder %v227_v3, 0  ;;  %s272_s5 = scalar_lea.sflag [#allocation5], %s749_s9  ;;  %s525_s29 = scalar_lea.vmem %s765_s25, 128 }
  0x41   : > { %v229_v4 = vsel %vm393_vm1, 0, %v227_v3  ;;  %v251_v13 = vsub.s32 0, %v248_v9  ;;  %p526_p1 = scmp.ne.s32.totalorder %s765_s25, %s525_s29  ;;  %s615_s6 = smov [#allocation8]  }
  0x42   : > { %v235_v5 = vrot.slane %v229_v4, 4  ;;  %s529_s15 = sshll.u32 %s615_s6, 4  ;;  %s530_s15 = int_to_ptr.vmem [resolvable:$false] %s529_s15 }
  0x43   : > { %p527_p8 = pnand %p526_p1, %p722_p0  ;;  %s531_s7 = scalar_lea.vmem %s530_s15, 256 }
  0x44   : > { %vm236_vm2 = vcmp.gt.s32.totalorder %v229_v4, %v235_v5  ;;  %p532_p11 = scmp.lt.s32.totalorder %s765_s25, %s530_s15  ;;  %p533_p2 = scmp.lt.s32.totalorder %s531_s7, %s525_s29 }
  0x45   : > { %v237_v7 = vsel %vm236_vm2, %v229_v4, %v235_v5  ;;  %p528_p13 = pneg %p527_p8 }
  0x46   : > { %v238_v8 = vrot.slane %v237_v7, 2  ;;  %p534_p12 = por %p533_p2, %p532_p11 }
  0x48   : > { %vm239_vm3 = vcmp.gt.s32.totalorder %v237_v7, %v238_v8  ;;  %p535_p3 = pnand %p534_p12, %p528_p13 }
  0x49   : > { %v240_v10 = vsel %vm239_vm3, %v237_v7, %v238_v8 }
  0x4a   : > { %v241_v11 = vrot.slane %v240_v10, 1 }
  0x4c   : > { %vm242_vm4 = vcmp.gt.s32.totalorder %v240_v10, %v241_v11 }
  0x4d   : > { %v243_v14 = vsel %vm242_vm4, %v240_v10, %v241_v11 }
  0x4e   : > { %vm244_vm5 = vcmp.gt.s32.totalorder %v243_v14, 0 }
  0x4f   : > { %v246_v15 = vsel %vm244_vm5, %v245_v12, 4294967295 }
  0x50   : > { %v252_v16 = vrot.slane %v246_v15, %v251_v13 }
  0x52   : > { %vm253_vm6 = vcmp.eq.s32.totalorder %v252_v16, %v248_v9 }
  0x53   : > { %v388_v18 = vsel %vm253_vm6, 1.0, %v614_v17 }
  0x54   : > { %256 = vmax.xlane.f32.xlu0 %v388_v18 }
  0xdd   : > { %v257_v19 = vpop.xlane.xlu0 %256 }
  0xde   : > { %v259_v20 = vsel %vm258_vm7, %v257_v19, 0.0 }
  0xdf   : > { %260 = vadd.xlane.f32.xlu0 %v259_v20 }
 0x168   : > { %v261_v21 = vpop.xlane.xlu0 %260 }
 0x169   : > { %v262_v22 = vrot.slane %v261_v21, 4 }
 0x16b   : > { %v263_v23 = vadd.f32 %v262_v22, %v261_v21 }
 0x16d   : > { %v264_v24 = vrot.slane %v263_v23, 2 }
 0x16f   : > { %v265_v25 = vadd.f32 %v264_v24, %v263_v23 }
 0x171   : > { %v266_v26 = vrot.slane %v265_v25, 1 }
 0x173   : > { %v267_v27 = vadd.f32 %v266_v26, %v265_v25 }
 0x175   : > { %394 = vpush %v267_v27 }
 0x1a6   : > { %s395_s27 = spop %394 }
 0x1a7   : > { %v269_v28 = vstv %s395_s27 }
 0x1a8   : > { %270 = vst [vmem:[%s213_s24] sm:$0xff] %v269_v28 }
 0x1a9   : > { %538 = shalt.err (!%p535_p3)
}
 0x1aa   : > { %s539_s11 = scalar_lea.hbm %s283_s21, 128  ;;  %s543_s19 = scalar_lea.hbm %s813_s3, 256 }
 0x1ab   : > { %p540_p5 = scmp.ne.s32.totalorder %s283_s21, %s539_s11  ;;  %p544_p4 = scmp.lt.s32.totalorder %s283_s21, %s813_s3 }
 0x1ac   : > { %p545_p10 = scmp.lt.s32.totalorder %s543_s19, %s539_s11 }
 0x1ad   : > { %p541_p7 = pnand %p540_p5, %p722_p0 }
 0x1ae   : > { %p546_p9 = por %p545_p10, %p544_p4 }
 0x1af   : > { %p542_p6 = pneg %p541_p7 }
 0x1b1   : > { %p547_p1 = pnand %p546_p9, %p542_p6 }
 0x1b3   : > { %550 = shalt.err (!%p547_p1)
}
 0x1b4   : > { %402 = dma.vmem_to_hbm [thread:$0]  (%p722_p0), %s765_s25, 128, %s283_s21, %s272_s5  }
 0x1b5 PF: > { %s297_s24 = sand.u32 1, %s589_s12   ;;  %p824_p8 = scmp.ne.s32.totalorder %s818_s23, 0 }
 0x1b6   : > { %p825_p13 = scmp.ge.s32.totalorder %s609_s17, 2  ;;  %s298_s26 = scalar_lea.sflag [#allocation5], %s297_s24 }
 0x1b8   : > { %p413_p11 = pnand %p825_p13, %p824_p8 }
 0x1ba   : > { %p414_p2 = pneg %p413_p11 }
 0x1bc   : > { %584 = dma.done.wait (%p414_p2), %s298_s26, 128  }
 0x1bd   : > { %586 = vsyncadd (%p414_p2), %s298_s26, 4294967168  ;;  %s20_s17 = sadd.s32 1, %s609_s17   ;;  %s826_s12 = smov %s593_s13 }
 0x1be   : > { %p17_p12 = scmp.ge.s32.totalorder %s20_s17, 4   ;;  %s827_s13 = smov %s597_s14 }
 0x1bf   : > { %s828_s14 = smov %s728_s10  ;;  %s829_s15 = smov %s605_s16 }
 0x1c0   : > { %s830_s16 = smov %s832_s28  ;;  %19 = sbr.rel (!%p17_p12) target bundleno = 7 (0x7), region = 90 }
 0x1c5   :  { %303 = vsyncpa [#allocation4], 1 }
 0x1c6   :  { %305 = vsyncpa [#allocation4 + $0x1], 1 }
 0x1c7   :  { %306 = vsyncpa [#allocation7], 1 }
 0x1c8   :  { %308 = vsyncpa [#allocation7 + $0x1], 1 }
 0x1c9   :  { %309 = vsyncpa [#allocation5], 1 }
 0x1ca   :  { %311 = vsyncpa [#allocation5 + $0x1], 1 }

</bundles_post_ra>
